<compile_context>
chip_gen: v6e
topology: v6e:2x2x1
jax: 0.10.0
libtpu: 0.0.40
codegen_flags: <defaults>
</compile_context>

<pallas_src>
import jax
import jax.numpy as jnp
from jax.experimental import pallas as pl
from jax.experimental.pallas import tpu as pltpu


def _make_seq_kernel(has_U: bool, has_Y: bool, n_state: int, n_Y: int):
    """Builds the fused T-step kernel specialized on which inputs exist."""

    def kernel(*refs):
        it = iter(refs)
        init_state_ref = next(it)
        u_ref = next(it) if has_U else None            # (1, B, F_U) block
        y_ref = next(it) if has_Y else None            # (1, B, n_Y) block
        w_cat_ref = next(it)                           # (S, S + n_Y) resident
        b_t_ref = next(it) if has_U else None          # (F_U, S)     resident
        d_t_ref = next(it) if has_Y else None          # (n_Y, S)     resident
        reg_ref = next(it)                             # (1, S)
        one_m_reg_ref = next(it)                       # (1, S)
        out_seq_ref = next(it)                         # (T, B, n_Y)  resident
        final_state_ref = next(it)                     # (B, S)       resident
        state_scr = next(it)                           # VMEM (B, S) f32 scratch

        t = pl.program_id(0)
        n_t = pl.num_programs(0)

        @pl.when(t == 0)
        def _():
            state_scr[...] = init_state_ref[...].astype(jnp.float32)

        state = state_scr[...]

        # One MXU push: [pre_state | expectation] = state @ [A_fused | C^T]
        fused = jnp.dot(state, w_cat_ref[...],
                        preferred_element_type=jnp.float32)
        pre = fused[:, :n_state]
        expectation = fused[:, n_state:]

        if has_Y:
            y = y_ref[0].astype(jnp.float32)           # (B, n_Y)
            output = expectation - y
            if n_Y == 1:
                # Y @ D^T with n_Y == 1 is a broadcast multiply (VPU, no MXU).
                pre = pre - y * d_t_ref[...]
            else:
                pre = pre - jnp.dot(y, d_t_ref[...],
                                    preferred_element_type=jnp.float32)
        else:
            output = expectation

        if has_U:
            pre = pre + jnp.dot(u_ref[0].astype(jnp.float32), b_t_ref[...],
                                preferred_element_type=jnp.float32)

        # s_t = (1 - reg) * s_{t-1} + reg * tanh(pre)
        new_state = state * one_m_reg_ref[...] + jnp.tanh(pre) * reg_ref[...]
        state_scr[...] = new_state

        # Store this step's error into the VMEM-resident output slab.
        out_seq_ref[t, :, :] = output.astype(out_seq_ref.dtype)

        @pl.when(t == n_t - 1)
        def _():
            final_state_ref[...] = new_state.astype(final_state_ref.dtype)

    return kernel


def ecnn_lstm_sequence_forward(init_state, U_seq, Y_seq,
                               A_w, B_w, C_w, D_w, reg_w, n_steps=None):
    """Runs the ECNN_LSTM_Cell recurrence for a whole sequence in one kernel.

    init_state : (B, S)
    U_seq      : (T, B, F_U) or None
    Y_seq      : (T, B, n_Y) or None
    A_w (S,S), B_w (S,F_U), C_w (n_Y,S), D_w (S,n_Y), reg_w (S,1)  --
    exactly the corresponding nn.Linear .weight tensors.
    Returns (outputs (T, B, n_Y), final_state (B, S)).
    """
    batch, n_state = init_state.shape
    n_Y = C_w.shape[0]
    n_feat_U = B_w.shape[1]
    has_U = U_seq is not None
    has_Y = Y_seq is not None
    if n_steps is None:
        if has_U:
            n_steps = U_seq.shape[0]
        elif has_Y:
            n_steps = Y_seq.shape[0]
        else:
            raise ValueError("n_steps must be given when both U and Y are None")
    dtype = init_state.dtype

    # Loop-invariant weight preprocessing (done once per sequence, not per step).
    f32 = jnp.float32
    A_T = A_w.T.astype(f32)                       # (S, S)
    C_T = C_w.T.astype(f32)                       # (S, n_Y)
    D_T = D_w.T.astype(f32)                       # (n_Y, S)
    B_T = B_w.T.astype(f32)                       # (F_U, S)
    A_fused = A_T + (C_T @ D_T) if has_Y else A_T  # fold output@D^T into A
    W_cat = jnp.concatenate([A_fused, C_T], axis=1)  # (S, S + n_Y)
    reg = reg_w.reshape(1, n_state).astype(f32)      # diagonal of regulator
    one_minus_reg = 1.0 - reg

    # Build args / specs conditionally: no zero tensors, no dead DMAs.
    args = [init_state]
    in_specs = [pl.BlockSpec((batch, n_state), lambda t: (0, 0))]
    if has_U:
        args.append(U_seq)
        in_specs.append(pl.BlockSpec((1, batch, n_feat_U), lambda t: (t, 0, 0)))
    if has_Y:
        args.append(Y_seq)
        in_specs.append(pl.BlockSpec((1, batch, n_Y), lambda t: (t, 0, 0)))
    args.append(W_cat)
    in_specs.append(pl.BlockSpec((n_state, n_state + n_Y), lambda t: (0, 0)))
    if has_U:
        args.append(B_T)
        in_specs.append(pl.BlockSpec((n_feat_U, n_state), lambda t: (0, 0)))
    if has_Y:
        args.append(D_T)
        in_specs.append(pl.BlockSpec((n_Y, n_state), lambda t: (0, 0)))
    args += [reg, one_minus_reg]
    in_specs += [pl.BlockSpec((1, n_state), lambda t: (0, 0)),
                 pl.BlockSpec((1, n_state), lambda t: (0, 0))]

    out_shape = (
        jax.ShapeDtypeStruct((n_steps, batch, n_Y), dtype),   # per-step errors
        jax.ShapeDtypeStruct((batch, n_state), dtype),        # final hidden state
    )
    out_specs = (
        pl.BlockSpec((n_steps, batch, n_Y), lambda t: (0, 0, 0)),  # resident slab
        pl.BlockSpec((batch, n_state), lambda t: (0, 0)),          # written at last t
    )

    kernel = _make_seq_kernel(has_U, has_Y, n_state, n_Y)
    return pl.pallas_call(
        kernel,
        out_shape=out_shape,
        grid=(n_steps,),
        in_specs=in_specs,
        out_specs=out_specs,
        scratch_shapes=[pltpu.VMEM((batch, n_state), jnp.float32)],
        compiler_params=pltpu.CompilerParams(
            dimension_semantics=("arbitrary",)),  # time recurrence is sequential
    )(*args)


def ecnn_lstm_cell_forward(state, U, Y, A_w, B_w, C_w, D_w, reg_w):
    """Single-step wrapper matching ECNN_LSTM_Cell.forward(state, U, Y)."""
    U_seq = None if U is None else U[None]
    Y_seq = None if Y is None else Y[None]
    out_seq, new_state = ecnn_lstm_sequence_forward(
        state, U_seq, Y_seq, A_w, B_w, C_w, D_w, reg_w, n_steps=1)
    return out_seq[0], new_state


# ----------------------------------------------------------------------------
# Pure-JAX reference (direct transcription of the PyTorch forward).
# ----------------------------------------------------------------------------
def _reference_cell(state, U, Y, A_w, B_w, C_w, D_w, reg_w):
    expectation = state @ C_w.T
    reg_diag = reg_w.reshape(-1)
    pre = state @ A_w.T
    if Y is not None:
        output = expectation - Y
        pre = pre + output @ D_w.T
    else:
        output = expectation
    if U is not None:
        pre = pre + U @ B_w.T
    new_state = state + (jnp.tanh(pre) - state) * reg_diag
    return output, new_state


def _torch_linear_init(key, out_features, in_features, dtype=jnp.float32):
    """nn.Linear default init: U(-1/sqrt(in), 1/sqrt(in)), weight (out, in)."""
    bound = 1.0 / (in_features ** 0.5)
    return jax.random.uniform(key, (out_features, in_features), dtype,
                              minval=-bound, maxval=bound)


if __name__ == "__main__":
    batch = 8
    n_features_U = 8
    n_state_neurons = 32
    n_features_Y = 1
    n_steps = 8

    key = jax.random.PRNGKey(0)
    ks = jax.random.split(key, 8)
    state0 = jax.random.normal(ks[0], (batch, n_state_neurons), jnp.float32)
    U_seq = jax.random.normal(ks[1], (n_steps, batch, n_features_U), jnp.float32)
    Y_seq = jax.random.normal(ks[2], (n_steps, batch, n_features_Y), jnp.float32)

    A_w = _torch_linear_init(ks[3], n_state_neurons, n_state_neurons)
    B_w = _torch_linear_init(ks[4], n_state_neurons, n_features_U)
    C_w = _torch_linear_init(ks[5], n_features_Y, n_state_neurons)
    D_w = _torch_linear_init(ks[6], n_state_neurons, n_features_Y)
    # Module initializes the regulator to ones; use random (0.2, 1.0] entries
    # so the (1 - reg) rewrite is actually exercised by the check.
    reg_w = jax.random.uniform(ks[7], (n_state_neurons, 1), jnp.float32,
                               minval=0.2, maxval=1.0)

    # --- fused multi-step kernel (U and Y provided) -------------------------
    out_seq, final_state = ecnn_lstm_sequence_forward(
        state0, U_seq, Y_seq, A_w, B_w, C_w, D_w, reg_w)
    jax.block_until_ready((out_seq, final_state))

    s_ref = state0
    ref_outs = []
    for t in range(n_steps):
        o, s_ref = _reference_cell(s_ref, U_seq[t], Y_seq[t],
                                   A_w, B_w, C_w, D_w, reg_w)
        ref_outs.append(o)
    ref_out_seq = jnp.stack(ref_outs)

    assert out_seq.shape == (n_steps, batch, n_features_Y)
    assert final_state.shape == (batch, n_state_neurons)
    assert jnp.allclose(out_seq, ref_out_seq, rtol=1e-4, atol=1e-4)
    assert jnp.allclose(final_state, s_ref, rtol=1e-4, atol=1e-4)

    # --- single-cell forward, all four U / Y branch combinations ------------
    for U1, Y1 in [(U_seq[0], Y_seq[0]), (U_seq[0], None),
                   (None, Y_seq[0]), (None, None)]:
        out1, s1 = ecnn_lstm_cell_forward(state0, U1, Y1,
                                          A_w, B_w, C_w, D_w, reg_w)
        jax.block_until_ready((out1, s1))
        ro, rs = _reference_cell(state0, U1, Y1, A_w, B_w, C_w, D_w, reg_w)
        assert out1.shape == ro.shape and s1.shape == rs.shape
        assert jnp.allclose(out1, ro, rtol=1e-4, atol=1e-4)
        assert jnp.allclose(s1, rs, rtol=1e-4, atol=1e-4)

    print("KERNEL_OK")
</pallas_src>

<mosaic_0001>
module attributes {stable_mosaic.version = 11 : i64} {
  func.func @kernel(%arg0: i32, %arg1: memref<8x32xf32, #tpu.memory_space<vmem>>, %arg2: memref<1x8x8xf32, #tpu.memory_space<vmem>>, %arg3: memref<1x8x1xf32, #tpu.memory_space<vmem>>, %arg4: memref<32x33xf32, #tpu.memory_space<vmem>>, %arg5: memref<8x32xf32, #tpu.memory_space<vmem>>, %arg6: memref<1x32xf32, #tpu.memory_space<vmem>>, %arg7: memref<1x32xf32, #tpu.memory_space<vmem>>, %arg8: memref<1x32xf32, #tpu.memory_space<vmem>>, %arg9: memref<8x8x1xf32, #tpu.memory_space<vmem>>, %arg10: memref<8x32xf32, #tpu.memory_space<vmem>>, %arg11: memref<8x32xf32, #tpu.memory_space<vmem>>) attributes {dimension_semantics = [#tpu.dimension_semantics<arbitrary>], iteration_bounds = array<i64: 8>, scalar_prefetch = 0 : i64, scratch_operands = 1 : i64, tpu.core_type = #tpu.core_type<tc>, window_params = [{pipeline_mode = #tpu.pipeline_mode<synchronous>, transform_indices = @transform_0, window_bounds = array<i64: 8, 32>}, {transform_indices = @transform_1, window_bounds = array<i64: 1, 8, 8>}, {transform_indices = @transform_2, window_bounds = array<i64: 1, 8, 1>}, {pipeline_mode = #tpu.pipeline_mode<synchronous>, transform_indices = @transform_3, window_bounds = array<i64: 32, 33>}, {pipeline_mode = #tpu.pipeline_mode<synchronous>, transform_indices = @transform_4, window_bounds = array<i64: 8, 32>}, {pipeline_mode = #tpu.pipeline_mode<synchronous>, transform_indices = @transform_5, window_bounds = array<i64: 1, 32>}, {pipeline_mode = #tpu.pipeline_mode<synchronous>, transform_indices = @transform_6, window_bounds = array<i64: 1, 32>}, {pipeline_mode = #tpu.pipeline_mode<synchronous>, transform_indices = @transform_7, window_bounds = array<i64: 1, 32>}, {pipeline_mode = #tpu.pipeline_mode<synchronous>, transform_indices = @transform_8, window_bounds = array<i64: 8, 8, 1>}, {pipeline_mode = #tpu.pipeline_mode<synchronous>, transform_indices = @transform_9, window_bounds = array<i64: 8, 32>}]} {
    %c0_i32 = arith.constant 0 : i32
    %0 = arith.cmpi eq, %arg0, %c0_i32 : i32
    %1 = arith.extui %0 : i1 to i32
    %c0_i32_0 = arith.constant 0 : i32
    %2 = arith.cmpi ne, %1, %c0_i32_0 : i32
    scf.if %2 {
      %c0_24 = arith.constant 0 : index
      %c0_25 = arith.constant 0 : index
      %37 = vector.load %arg1[%c0_24, %c0_25] : memref<8x32xf32, #tpu.memory_space<vmem>>, vector<8x32xf32>
      %c0_26 = arith.constant 0 : index
      %c0_27 = arith.constant 0 : index
      %38 = vector.load %arg11[%c0_26, %c0_27] : memref<8x32xf32, #tpu.memory_space<vmem>>, vector<8x32xf32>
      tpu.vector_store %arg11[%c0_26, %c0_27], %37 {strides = array<i32>} : memref<8x32xf32, #tpu.memory_space<vmem>>, vector<8x32xf32>,
    } else {
    }
    %c0 = arith.constant 0 : index
    %c0_1 = arith.constant 0 : index
    %3 = vector.load %arg11[%c0, %c0_1] : memref<8x32xf32, #tpu.memory_space<vmem>>, vector<8x32xf32>
    %c0_2 = arith.constant 0 : index
    %c0_3 = arith.constant 0 : index
    %4 = vector.load %arg4[%c0_2, %c0_3] : memref<32x33xf32, #tpu.memory_space<vmem>>, vector<32x33xf32>
    %cst = arith.constant dense<0.000000e+00> : vector<8x33xf32>
    %5 = tpu.matmul %3, %4, %cst {dimension_numbers = #tpu.dot_dimension_numbers<[1], [0], [0], [1], [0, 0, 1, 1], [], []>} : vector<8x32xf32>, vector<32x33xf32>, vector<8x33xf32> -> vector<8x33xf32>
    %6 = vector.extract_strided_slice %5 {offsets = [0, 0], sizes = [8, 32], strides = [1, 1]} : vector<8x33xf32> to vector<8x32xf32>
    %7 = vector.extract_strided_slice %5 {offsets = [0, 32], sizes = [8, 1], strides = [1, 1]} : vector<8x33xf32> to vector<8x1xf32>
    %c0_4 = arith.constant 0 : index
    %c0_5 = arith.constant 0 : index
    %c0_6 = arith.constant 0 : index
    %8 = vector.load %arg3[%c0_4, %c0_5, %c0_6] : memref<1x8x1xf32, #tpu.memory_space<vmem>>, vector<1x8x1xf32>
    %9 = vector.shape_cast %8 : vector<1x8x1xf32> to vector<8x1xf32>
    %10 = arith.subf %7, %9 : vector<8x1xf32>
    %c0_7 = arith.constant 0 : index
    %c0_8 = arith.constant 0 : index
    %11 = vector.load %arg6[%c0_7, %c0_8] : memref<1x32xf32, #tpu.memory_space<vmem>>, vector<1x32xf32>
    %12 = vector.broadcast %9 : vector<8x1xf32> to vector<8x32xf32>
    %13 = vector.broadcast %11 : vector<1x32xf32> to vector<8x32xf32>
    %14 = arith.mulf %12, %13 : vector<8x32xf32>
    %15 = arith.subf %6, %14 : vector<8x32xf32>
    %c0_9 = arith.constant 0 : index
    %c0_10 = arith.constant 0 : index
    %c0_11 = arith.constant 0 : index
    %16 = vector.load %arg2[%c0_9, %c0_10, %c0_11] : memref<1x8x8xf32, #tpu.memory_space<vmem>>, vector<1x8x8xf32>
    %17 = vector.shape_cast %16 : vector<1x8x8xf32> to vector<8x8xf32>
    %c0_12 = arith.constant 0 : index
    %c0_13 = arith.constant 0 : index
    %18 = vector.load %arg5[%c0_12, %c0_13] : memref<8x32xf32, #tpu.memory_space<vmem>>, vector<8x32xf32>
    %cst_14 = arith.constant dense<0.000000e+00> : vector<8x32xf32>
    %19 = tpu.matmul %17, %18, %cst_14 {dimension_numbers = #tpu.dot_dimension_numbers<[1], [0], [0], [1], [0, 0, 1, 1], [], []>} : vector<8x8xf32>, vector<8x32xf32>, vector<8x32xf32> -> vector<8x32xf32>
    %20 = arith.addf %15, %19 : vector<8x32xf32>
    %c0_15 = arith.constant 0 : index
    %c0_16 = arith.constant 0 : index
    %21 = vector.load %arg8[%c0_15, %c0_16] : memref<1x32xf32, #tpu.memory_space<vmem>>, vector<1x32xf32>
    %22 = vector.broadcast %21 : vector<1x32xf32> to vector<8x32xf32>
    %23 = arith.mulf %3, %22 : vector<8x32xf32>
    %24 = math.tanh %20 : vector<8x32xf32>
    %c0_17 = arith.constant 0 : index
    %c0_18 = arith.constant 0 : index
    %25 = vector.load %arg7[%c0_17, %c0_18] : memref<1x32xf32, #tpu.memory_space<vmem>>, vector<1x32xf32>
    %26 = vector.broadcast %25 : vector<1x32xf32> to vector<8x32xf32>
    %27 = arith.mulf %24, %26 : vector<8x32xf32>
    %28 = arith.addf %23, %27 : vector<8x32xf32>
    %c0_19 = arith.constant 0 : index
    %c0_20 = arith.constant 0 : index
    %29 = vector.load %arg11[%c0_19, %c0_20] : memref<8x32xf32, #tpu.memory_space<vmem>>, vector<8x32xf32>
    tpu.vector_store %arg11[%c0_19, %c0_20], %28 {strides = array<i32>} : memref<8x32xf32, #tpu.memory_space<vmem>>, vector<8x32xf32>,
    %30 = arith.index_cast %arg0 : i32 to index
    %c0_21 = arith.constant 0 : index
    %c0_22 = arith.constant 0 : index
    %31 = vector.load %arg9[%30, %c0_21, %c0_22] : memref<8x8x1xf32, #tpu.memory_space<vmem>>, vector<1x8x1xf32>
    %32 = vector.shape_cast %31 : vector<1x8x1xf32> to vector<8x1xf32>
    %33 = vector.shape_cast %10 : vector<8x1xf32> to vector<1x8x1xf32>
    tpu.vector_store %arg9[%30, %c0_21, %c0_22], %33 {strides = array<i32>} : memref<8x8x1xf32, #tpu.memory_space<vmem>>, vector<1x8x1xf32>,
    %c7_i32 = arith.constant 7 : i32
    %34 = arith.cmpi eq, %arg0, %c7_i32 : i32
    %35 = arith.extui %34 : i1 to i32
    %c0_i32_23 = arith.constant 0 : i32
    %36 = arith.cmpi ne, %35, %c0_i32_23 : i32
    scf.if %36 {
      %c0_24 = arith.constant 0 : index
      %c0_25 = arith.constant 0 : index
      %37 = vector.load %arg10[%c0_24, %c0_25] : memref<8x32xf32, #tpu.memory_space<vmem>>, vector<8x32xf32>
      tpu.vector_store %arg10[%c0_24, %c0_25], %28 {strides = array<i32>} : memref<8x32xf32, #tpu.memory_space<vmem>>, vector<8x32xf32>,
    } else {
    }
    return
  }
  func.func @transform_0(%arg0: i32) -> (i32, i32) {
    %c0_i32 = arith.constant 0 : i32
    %c0_i32_0 = arith.constant 0 : i32
    %c0_i32_1 = arith.constant 0 : i32
    return %c0_i32, %c0_i32_0 : i32, i32
  }
  func.func @transform_1(%arg0: i32) -> (i32, i32, i32) {
    %c0_i32 = arith.constant 0 : i32
    %c0_i32_0 = arith.constant 0 : i32
    %c0_i32_1 = arith.constant 0 : i32
    return %arg0, %c0_i32, %c0_i32_0 : i32, i32, i32
  }
  func.func @transform_2(%arg0: i32) -> (i32, i32, i32) {
    %c0_i32 = arith.constant 0 : i32
    %c0_i32_0 = arith.constant 0 : i32
    %c0_i32_1 = arith.constant 0 : i32
    return %arg0, %c0_i32, %c0_i32_0 : i32, i32, i32
  }
  func.func @transform_3(%arg0: i32) -> (i32, i32) {
    %c0_i32 = arith.constant 0 : i32
    %c0_i32_0 = arith.constant 0 : i32
    %c0_i32_1 = arith.constant 0 : i32
    return %c0_i32, %c0_i32_0 : i32, i32
  }
  func.func @transform_4(%arg0: i32) -> (i32, i32) {
    %c0_i32 = arith.constant 0 : i32
    %c0_i32_0 = arith.constant 0 : i32
    %c0_i32_1 = arith.constant 0 : i32
    return %c0_i32, %c0_i32_0 : i32, i32
  }
  func.func @transform_5(%arg0: i32) -> (i32, i32) {
    %c0_i32 = arith.constant 0 : i32
    %c0_i32_0 = arith.constant 0 : i32
    %c0_i32_1 = arith.constant 0 : i32
    return %c0_i32, %c0_i32_0 : i32, i32
  }
  func.func @transform_6(%arg0: i32) -> (i32, i32) {
    %c0_i32 = arith.constant 0 : i32
    %c0_i32_0 = arith.constant 0 : i32
    %c0_i32_1 = arith.constant 0 : i32
    return %c0_i32, %c0_i32_0 : i32, i32
  }
  func.func @transform_7(%arg0: i32) -> (i32, i32) {
    %c0_i32 = arith.constant 0 : i32
    %c0_i32_0 = arith.constant 0 : i32
    %c0_i32_1 = arith.constant 0 : i32
    return %c0_i32, %c0_i32_0 : i32, i32
  }
  func.func @transform_8(%arg0: i32) -> (i32, i32, i32) {
    %c0_i32 = arith.constant 0 : i32
    %c0_i32_0 = arith.constant 0 : i32
    %c0_i32_1 = arith.constant 0 : i32
    %c0_i32_2 = arith.constant 0 : i32
    return %c0_i32, %c0_i32_0, %c0_i32_1 : i32, i32, i32
  }
  func.func @transform_9(%arg0: i32) -> (i32, i32) {
    %c0_i32 = arith.constant 0 : i32
    %c0_i32_0 = arith.constant 0 : i32
    %c0_i32_1 = arith.constant 0 : i32
    return %c0_i32, %c0_i32_0 : i32, i32
  }
}

</mosaic_0001>

<bundles_post_ra>
// kernel: tpu_custom_call.1
= control target key start
LH: loop header
LB: loop body
LE: loop exit
PB: predicated region body
PF: predicated region fallthrough
CT: control target
= control target key end

     0   :  { %15 = vsyncpa [#allocation4], 0  ;;  %s1005_s0 = inlined_call_operand.vmem [shape: f32[8,32], index: 0, kind: input, shape index: {}]   ;;  %s1006_s1 = inlined_call_operand.vmem [shape: f32[8,8,8], index: 1, kind: input, shape index: {}]   ;;  %s1007_s2 = inlined_call_operand.vmem [shape: f32[8,8,1], index: 2, kind: input, shape index: {}]   ;;  %s1008_s3 = inlined_call_operand.hbm [shape: f32[32,33], index: 3, kind: input, shape index: {}]   ;;  %s1009_s4 = inlined_call_operand.hbm [shape: f32[8,32], index: 4, kind: input, shape index: {}]   ;;  %s1010_s5 = inlined_call_operand.vmem [shape: f32[1,32], index: 5, kind: input, shape index: {}]   ;;  %s1011_s6 = inlined_call_operand.vmem [shape: f32[1,32], index: 6, kind: input, shape index: {}]   ;;  %s1012_s7 = inlined_call_operand.vmem [shape: f32[1,32], index: 7, kind: input, shape index: {}]   ;;  %s1013_s8 = inlined_call_operand.vmem [shape: f32[8,8,1], index: 8, kind: output, shape index: {0}]   ;;  %s1014_s9 = inlined_call_operand.hbm [shape: f32[8,32], index: 9, kind: output, shape index: {1}]  }
   0x1   :  { %16 = vsyncpa [#allocation7], 0 }
   0x2   :  { %17 = vsyncpa [#allocation5], 0  ;;  %s908_s30 = smov 0  }
   0x3 LB: > { %s914_s10 = sadd.s32 4294967295, %s846_s30   ;;  %p662_p0 = scmp.ge.s32.totalorder %s846_s30, 1  ;;  %s846_s30 = sphi %s908_s30, %s23_s30  }
   0x4   : > { %p248_p1 = scmp.lt.s32.totalorder %s846_s30, 9  ;;  %s848_s11 = smov [#allocation3]  }
   0x5   : > { %s263_s12 = sshll.u32 %s848_s11, 4  ;;  %p725_p4 = scmp.eq.s32.totalorder %s914_s10, 0  ;;  %s264_s12 = int_to_ptr.vmem [resolvable:$true] %s263_s12 }
   0x6   : > { %p919_p3 = pnand %p662_p0, %p248_p1  ;;  %s849_s14 = smov [#allocation6]  }
   0x7   : > { %s277_s15 = sshll.u32 %s849_s14, 4  ;;  %s763_s17 = scalar_lea.vmem %s264_s12, 512  ;;  %s278_s15 = int_to_ptr.vmem [resolvable:$true] %s277_s15 }
   0x8   : > { %p718_p5 = pneg %p919_p3  ;;  %p764_p8 = scmp.ne.s32.totalorder %s264_s12, %s763_s17 }
   0x9   : > { %p771_p11 = scmp.lt.s32.totalorder %s264_s12, %s264_s12  ;;  %p772_p12 = scmp.lt.s32.totalorder %s763_s17, %s763_s17 }
   0xa   : > { %p928_p6 = pnand %p725_p4, %p718_p5 }
   0xb   : > { %p773_p13 = por %p772_p12, %p771_p11 }
   0xc   : > { %p754_p7 = pneg %p928_p6 }
   0xe   : > { %p766_p9 = pnand %p764_p8, %p754_p7 }
  0x10   : > { %p767_p10 = pneg %p766_p9 }
  0x12   : > { %p774_p0 = pnand %p773_p13, %p767_p10 }
  0x14   : > { %777 = shalt.err (!%p774_p0)
}
  0x15   : > { %s850_s18 = smov 128   ;;  %s851_s19 = smov 8  }
  0x16   : > { %721 = dma.hbm_to_vmem [thread:$0]  (!%p928_p6), %s1008_s3, 512, %s264_s12, [#allocation4], %s850_s18, %s850_s18, %s851_s19  }
  0x17   : > { %s789_s22 = scalar_lea.vmem %s278_s15, 128  ;;  %p797_p9 = scmp.lt.s32.totalorder %s278_s15, %s278_s15 }
  0x18   : > { %p790_p1 = scmp.ne.s32.totalorder %s278_s15, %s789_s22  ;;  %p798_p2 = scmp.lt.s32.totalorder %s789_s22, %s789_s22 }
  0x1a   : > { %p792_p5 = pnand %p790_p1, %p754_p7  ;;  %p799_p11 = por %p798_p2, %p797_p9 }
  0x1c   : > { %p793_p8 = pneg %p792_p5 }
  0x1e   : > { %p800_p10 = pnand %p799_p11, %p793_p8 }
  0x20   : > { %803 = shalt.err (!%p800_p10)
}
  0x21   : > { %724 = dma.hbm_to_vmem [thread:$0]  (!%p928_p6), %s1009_s4, 128, %s278_s15, [#allocation7]  }
  0x22   : > { %313 = sbr.rel (%p919_p3) target bundleno = 388 (0x184), region = 52 }
  0x27   : > { %833 = dma.done.wait (%p725_p4), [#allocation4], 512  }
  0x28   : > { %835 = vsyncadd (%p725_p4), [#allocation4], 4294966784 }
  0x29   : > { %837 = dma.done.wait (%p725_p4), [#allocation7], 128  }
  0x2a   : > { %839 = vsyncadd (%p725_p4), [#allocation7], 4294967168  ;;  %p351_p2 = scmp.lt.s32.totalorder %s914_s10, 7  ;;  %p1017_p3 = scmp.ne.s32.totalorder %s914_s10, 0 }
  0x2c   : > { %s352_s25 = scalar_select %p351_p2, %s914_s10, 7 }
  0x2d   : > { %362 = sbr.rel (%p1017_p3) target bundleno = 52 (0x34), region = 64 }
  0x2e   : > { %s669_s26 = sshll.u32 %s352_s25, 3 }
  0x2f   : > { %s354_s29 = scalar_lea.vmem %s1006_s1, %s669_s26  ;;  %s358_s13 = scalar_lea.vmem %s1007_s2, %s669_s26 }
  0x32   : > { %v363_v0 = vld [vmem:[%s1005_s0] sm:$0xff]  ;;  %vm364_vm0 = vcmask 261120  }
  0x33   : > { %365 = vst.msk [vmem:[#allocation2] sm:$0xff] %vm364_vm0, %v363_v0 }
  0x34 PF: > { %v370_v1 = vld [vmem:[#allocation3 + $0x18] sm:$0xff]  ;;  %v852_v2 = vmov 0.0   ;;  %v369_v3 = vld [vmem:[#allocation3 + $0x10] sm:$0xff]  ;;  %vm853_vm1 = vmmov 0   ;;  %v465_v4 = vld [vmem:[#allocation6] sm:$0xff]  ;;  %vm466_vm2 = vcmask 64512  }
  0x35   : > { %690 = vmatprep.subr.mxu0 %v852_v2  ;;  %698 = vmatprep.mubr.msk.f32.mxu0 %vm853_vm1, %v852_v2  ;;  %v464_v5 = vld [vmem:[%s354_s29] sm:$0xff]  ;;  %v368_v6 = vld [vmem:[#allocation3 + $0x8] sm:$0xff]  ;;  %v367_v8 = vld [vmem:[#allocation3] sm:$0xff]  ;;  %vm371_vm3 = vcmask 261120   ;;  %s854_s16 = smov 32   ;;  %v855_v10 = vmov 0  }
  0x36   : > { %691 = vmatpush3.msra.mxu0 %v370_v1  ;;  %701 = vmatprep.subr.mxu1 %v852_v2  ;;  %v445_v7 = vld [vmem:[%s358_s13] sm:$0xff]  ;;  %s856_s19 = smov 96   ;;  %s677_s24 = sshll.u32 %s914_s10, 3  ;;  %vm566_vm4 = vcmask 7168  }
  0x37   : > { %692 = vmatprep.subr.mxu0 %v852_v2  ;;  %702 = vmatpush3.msra.mxu1 %v465_v4  ;;  %v673_v12 = vld [vmem:[%s1010_s5] ss:$0 sm:$0xff]  ;;  %s565_s27 = scalar_lea.vmem %s1013_s8, %s677_s24  ;;  %p678_p4 = scmp.ne.s32.totalorder %s914_s10, 7 }
  0x38   : > { %693 = vmatpush3.msra.mxu0 %v369_v3  ;;  %703 = vmatprep.mubr.msk.f32.mxu1 %vm853_vm1, %v852_v2  ;;  %v675_v22 = vld [vmem:[%s1012_s7] ss:$0 sm:$0xff] }
  0x39   : > { %694 = vmatprep.subr.mxu0 %v852_v2  ;;  %704 = vmatmul.mubr.msk.f32.vlgmr.msra.gmra.mxu1 %vm466_vm2, %v464_v5  ;;  %v676_v23 = vld [vmem:[%s1011_s6] ss:$0 sm:$0xff] }
  0x3a   : > { %695 = vmatpush3.msra.mxu0 %v368_v6  ;;  %v366_v9 = vld [vmem:[#allocation2] sm:$0xff]  ;;  %447 = vrot.lane.b32.xlu0 %v445_v7, %s854_s16 }
  0x3b   : > { %696 = vmatprep.subr.mxu0 %v852_v2  ;;  %749 = vset.pattern.permute.xlu0 %v855_v10  ;;  %v548_v24 = vmul.f32 %v675_v22, %v366_v9 }
  0x3c   : > { %697 = vmatpush3.msra.mxu0 %v367_v8 }
  0x3d   : > { %699 = vmatmul.mubr.msk.f32.vlgmr.msra.gmra.mxu0 %vm371_vm3, %v366_v9 }
  0x3e   : > { %453 = vperm.xlu0 %749, %v445_v7  }
  0xac   : > { %v448_v11 = vpop.permute.xlu0 %447 }
  0xb9   : > { %v454_v13 = vpop.permute.xlu0 %453 }
  0xba   : > { %v462_v15 = vmul.f32 %v673_v12, %v454_v13 }
  0xf9   : > { %v536_v14 = vpop.f32.mrf.mxu1 }
  0xfb   : > { %v705_v16 = vpop.f32.mrf.mxu1 }
  0xfd   : > { %v441_v17 = vpop.f32.mrf.mxu0 }
  0xfe   : > { %v463_v18 = vsub.f32 %v441_v17, %v462_v15  ;;  %v450_v19 = vsub.f32 %v441_v17, %v448_v11 }
  0xff   : > { %v700_v20 = vpop.f32.mrf.mxu0 }
 0x100   : > { %v540_v21 = vadd.f32 %v536_v14, %v463_v18  ;;  %561 = vrot.lane.b32.xlu1 %v450_v19, %s856_s19 }
 0x102   : > { %750 = vtanh.f32 %v540_v21 }
 0x10f   : > { %v751_v25 = vpop.eup %750 }
 0x110   : > { %v557_v26 = vmul.f32 %v751_v25, %v676_v23 }
 0x112   : > { %v558_v27 = vadd.f32 %v557_v26, %v548_v24 }
 0x114   : > { %559 = vst.msk [vmem:[#allocation2] sm:$0xff] %vm371_vm3, %v558_v27 }
 0x16f   : > { %571 = sbr.rel (%p678_p4) target bundleno = 373 (0x175), region = 68 }
 0x172   : > { %v562_v28 = vpop.permute.xlu1 %561 }
 0x173   : > { %567 = vst.msk [vmem:[%s565_s27] sm:$0xff] %vm566_vm4, %v562_v28 }
 0x174   : > { %572 = vst.msk [vmem:[#allocation8] sm:$0xff] %vm371_vm3, %v558_v27 }
 0x175 PF: > { %p729_p6 = scmp.eq.s32.totalorder %s914_s10, 7  ;;  %s857_s28 = smov [#allocation8]  }
 0x176   : > { %s583_s29 = sshll.u32 %s857_s28, 4  ;;  %s584_s29 = int_to_ptr.vmem [resolvable:$true] %s583_s29 }
 0x177   : > { %s804_s11 = scalar_lea.vmem %s584_s29, 128  ;;  %p811_p0 = scmp.lt.s32.totalorder %s584_s29, %s584_s29 }
 0x178   : > { %p805_p7 = scmp.ne.s32.totalorder %s584_s29, %s804_s11  ;;  %p812_p1 = scmp.lt.s32.totalorder %s804_s11, %s804_s11 }
 0x17a   : > { %p806_p12 = pnand %p805_p7, %p729_p6  ;;  %p813_p5 = por %p812_p1, %p811_p0 }
 0x17c   : > { %p807_p13 = pneg %p806_p12 }
 0x17e   : > { %p814_p8 = pnand %p813_p5, %p807_p13 }
 0x180   : > { %817 = shalt.err (!%p814_p8)
}
 0x181   : > { %715 = dma.vmem_to_hbm [thread:$0]  (%p729_p6), %s584_s29, 128, %s1014_s9, [#allocation5]  }
 0x182   : > { %841 = dma.done.wait (%p729_p6), [#allocation5], 128  }
 0x183   : > { %843 = vsyncadd (%p729_p6), [#allocation5], 4294967168 }
 0x184 PF: > { %s23_s30 = sadd.s32 1, %s846_s30  }
 0x185   : > { %p20_p9 = scmp.ge.s32.totalorder %s23_s30, 10  }
 0x187   :  { %22 = sbr.rel (!%p20_p9) target bundleno = 3 (0x3), region = 108 }
 0x18c   :  { %599 = vsyncpa [#allocation4], 1 }
 0x18d   :  { %601 = vsyncpa [#allocation4 + $0x1], 1 }
 0x18e   :  { %602 = vsyncpa [#allocation7], 1 }
 0x18f   :  { %603 = vsyncpa [#allocation5], 1 }
 0x190   :  { %605 = vsyncpa [#allocation5 + $0x1], 1 }

</bundles_post_ra>
